<compile_context>
chip_gen: v5e
topology: v5e:2x2
jax: 0.10.0
libtpu: 0.0.40
codegen_flags: <defaults>
</compile_context>

<pallas_src>
import jax
import jax.numpy as jnp
from jax.experimental import pallas as pl
from jax.experimental.pallas import tpu as pltpu


NUM_LAYERS = 3
INPUT_SIZE = 32   # must equal prod(x.shape), since forward does x.view(-1)
HIDDEN = 5
OUT = 2

LANES = 128                                   # lane-dense minor dim
ROWS = ((INPUT_SIZE + 1 + 7) // 8) * 8        # 32 weight rows + 1 bias row, padded to 8 -> 40


def _affine_kernel(x_ref, w_ref, o_ref):
    # x_ref: (ROWS, 1)      augmented input column  [x_0 .. x_31, 1, 0, ...]
    # w_ref: (ROWS, LANES)  packed slab: rows 0..31 = W_eff (lanes 0..1), row 32 = b_eff
    # o_ref: (1, LANES)     lane-dense output; lanes 0..1 hold the result
    # VPU broadcast-multiply + cross-sublane (XLU) reduce -- no MXU, no masked lane stores.
    o_ref[...] = jnp.sum(x_ref[...] * w_ref[...], axis=0, keepdims=True)


def pack_params(params):
    """One-time parameter preprocessing (outside the kernel).

    Collapses the activation-free linear chain into a single affine map and
    packs it into one lane-aligned float32 slab of shape (ROWS, 128):
      rows 0..INPUT_SIZE-1, lanes 0..OUT-1 : W_eff
      row  INPUT_SIZE,      lanes 0..OUT-1 : b_eff
      everything else                      : 0
    """
    w1, b1, wmid, bmid, wout, bout = params
    w_eff = w1                          # (INPUT_SIZE, HIDDEN)
    b_eff = b1                          # (1, HIDDEN)
    for i in range(NUM_LAYERS):
        w_eff = w_eff @ wmid[i]
        b_eff = b_eff @ wmid[i] + bmid[i]
    w_eff = w_eff @ wout                # (INPUT_SIZE, OUT)
    b_eff = b_eff @ wout + bout         # (1, OUT)

    slab = jnp.zeros((ROWS, LANES), jnp.float32)
    slab = slab.at[:INPUT_SIZE, :OUT].set(w_eff.astype(jnp.float32))
    slab = slab.at[INPUT_SIZE, :OUT].set(b_eff.reshape(OUT).astype(jnp.float32))
    return slab


def test_net_forward(x, slab):
    """Forward pass equivalent to PyTorch test_net.forward.

    x: any shape whose total size == INPUT_SIZE (flattened, like x.view(-1)).
    slab: output of pack_params(params).
    Returns: float32 array of shape (2,).
    """
    x_flat = x.reshape(-1).astype(jnp.float32)
    # augmented input column [x, 1], padded to ROWS sublanes
    x_col = jnp.zeros((ROWS, 1), jnp.float32)
    x_col = x_col.at[:INPUT_SIZE, 0].set(x_flat)
    x_col = x_col.at[INPUT_SIZE, 0].set(1.0)

    vmem = pl.BlockSpec(memory_space=pltpu.MemorySpace.VMEM)
    out = pl.pallas_call(
        _affine_kernel,
        out_shape=jax.ShapeDtypeStruct((1, LANES), jnp.float32),
        in_specs=[vmem, vmem],
        out_specs=vmem,
    )(x_col, slab)
    return out[0, :OUT]


def init_params(key, num_layers, input_size):
    """Deterministic init mimicking nn.Linear's U(-1/sqrt(fan_in), 1/sqrt(fan_in))."""
    keys = jax.random.split(key, 6)

    def uniform(k, shape, fan_in):
        bound = 1.0 / jnp.sqrt(jnp.float32(fan_in))
        return jax.random.uniform(k, shape, jnp.float32, -bound, bound)

    # stored as (in, out) so math is x @ W
    w1 = uniform(keys[0], (input_size, HIDDEN), input_size)
    b1 = uniform(keys[1], (1, HIDDEN), input_size)
    wmid = uniform(keys[2], (num_layers, HIDDEN, HIDDEN), HIDDEN)
    bmid = uniform(keys[3], (num_layers, 1, HIDDEN), HIDDEN)
    wout = uniform(keys[4], (HIDDEN, OUT), HIDDEN)
    bout = uniform(keys[5], (1, OUT), HIDDEN)
    return (w1, b1, wmid, bmid, wout, bout)


def reference_forward(x, params):
    """Pure-JAX reference of the ORIGINAL (un-collapsed) layer chain."""
    w1, b1, wmid, bmid, wout, bout = params
    h = x.reshape(1, -1).astype(jnp.float32) @ w1 + b1
    for i in range(NUM_LAYERS):
        h = h @ wmid[i] + bmid[i]
    return (h @ wout + bout).reshape(OUT)


if __name__ == "__main__":
    key = jax.random.PRNGKey(0)
    k_param, k_x = jax.random.split(key)

    params = init_params(k_param, NUM_LAYERS, INPUT_SIZE)
    slab = pack_params(params)

    # example input: shape (2, 4, 4) -> flattened length 32 == INPUT_SIZE
    x = jax.random.normal(k_x, (2, 4, 4), jnp.float32)

    y = test_net_forward(x, slab)
    jax.block_until_ready(y)

    y_ref = reference_forward(x, params)
    assert y.shape == (OUT,)
    assert jnp.allclose(y, y_ref, atol=1e-5, rtol=1e-4), (y, y_ref)

    print("KERNEL_OK")
</pallas_src>

<mosaic_0001>
module attributes {stable_mosaic.version = 11 : i64} {
  func.func @_affine_kernel(%arg0: memref<40x1xf32, #tpu.memory_space<vmem>>, %arg1: memref<40x128xf32, #tpu.memory_space<vmem>>, %arg2: memref<1x128xf32, #tpu.memory_space<vmem>>) attributes {dimension_semantics = [], scalar_prefetch = 0 : i64, scratch_operands = 0 : i64, tpu.core_type = #tpu.core_type<tc>} {
    %c0 = arith.constant 0 : index
    %c0_0 = arith.constant 0 : index
    %0 = vector.load %arg0[%c0, %c0_0] : memref<40x1xf32, #tpu.memory_space<vmem>>, vector<40x1xf32>
    %c0_1 = arith.constant 0 : index
    %c0_2 = arith.constant 0 : index
    %1 = vector.load %arg1[%c0_1, %c0_2] : memref<40x128xf32, #tpu.memory_space<vmem>>, vector<40x128xf32>
    %2 = vector.broadcast %0 : vector<40x1xf32> to vector<40x128xf32>
    %3 = arith.mulf %2, %1 : vector<40x128xf32>
    %cst = arith.constant dense<0.000000e+00> : vector<128xf32>
    %4 = vector.multi_reduction <add>, %3, %cst [0] : vector<40x128xf32> to vector<128xf32>
    %5 = vector.shape_cast %4 : vector<128xf32> to vector<1x128xf32>
    %c0_3 = arith.constant 0 : index
    %c0_4 = arith.constant 0 : index
    %6 = vector.load %arg2[%c0_3, %c0_4] : memref<1x128xf32, #tpu.memory_space<vmem>>, vector<1x128xf32>
    tpu.vector_store %arg2[%c0_3, %c0_4], %5 {strides = array<i32>} : memref<1x128xf32, #tpu.memory_space<vmem>>, vector<1x128xf32>,
    return
  }
}

</mosaic_0001>

<bundles_post_ra>
// kernel: tpu_custom_call.1
= control target key start
LH: loop header
LB: loop body
LE: loop exit
PB: predicated region body
PF: predicated region fallthrough
CT: control target
= control target key end

     0   :  { %v110_v2 = vmov 0   ;;  %s160_s0 = inlined_call_operand.vmem [shape: f32[40,1], index: 0, kind: input, shape index: {}]   ;;  %s161_s1 = inlined_call_operand.vmem [shape: f32[40,128], index: 1, kind: input, shape index: {}]   ;;  %s162_s2 = inlined_call_operand.hbm [shape: f32[1,128], index: 2, kind: output, shape index: {}]  }
   0x1   :  { %v14_v0 = vld [vmem:[%s160_s0 + $0x10] sm:$0xff]  ;;  %v12_v1 = vld [vmem:[%s160_s0] sm:$0xff]  ;;  %82 = vset.pattern.permute.xlu1 %v110_v2  ;;  %81 = vset.pattern.permute.xlu0 %v110_v2 }
   0x2   :  { %v16_v3 = vld [vmem:[%s160_s0 + $0x20] sm:$0xff]  ;;  %34 = vperm.xlu1 %82, %v14_v0   ;;  %24 = vperm.xlu0 %81, %v12_v1  }
   0x3   :  { %7 = vsyncpa [#allocation3], 0  ;;  %83 = vset.pattern.permute.xlu2 %v110_v2  ;;  %v15_v4 = vld [vmem:[%s160_s0 + $0x18] sm:$0xff]  ;;  %v13_v5 = vld [vmem:[%s160_s0 + $0x8] sm:$0xff]  ;;  %s111_s28 = smov [#allocation2]   ;;  %s70_s4 = sshll.u32 %s162_s2, 4  ;;  %s71_s4 = int_to_ptr.hbm [resolvable:$true] %s70_s4 }
   0x4   :  { %44 = vperm.xlu2 %83, %v16_v3   ;;  %v17_v8 = vld [vmem:[%s161_s1] sm:$0xff]  ;;  %v18_v9 = vld [vmem:[%s161_s1 + $0x8] sm:$0xff]  ;;  %v19_v10 = vld [vmem:[%s161_s1 + $0x10] sm:$0xff]  ;;  %s68_s29 = sshll.u32 %s111_s28, 4  ;;  %s69_s29 = int_to_ptr.vmem [resolvable:$true] %s68_s29 }
   0x5   :  { %v20_v14 = vld [vmem:[%s161_s1 + $0x18] sm:$0xff]  ;;  %v21_v16 = vld [vmem:[%s161_s1 + $0x20] sm:$0xff] }
   0xa   :  { %39 = vperm.xlu1 %82, %v15_v4   ;;  %29 = vperm.xlu0 %81, %v13_v5  }
  0x5e   :  { %v45_v17 = vpop.permute.xlu2 %44 }
  0x5f   :  { %v51_v22 = vmul.f32 %v45_v17, %v21_v16 }
  0x74   :  { %v35_v6 = vpop.permute.xlu1 %34  ;;  %v25_v7 = vpop.permute.xlu0 %24 }
  0x75   :  { %v47_v12 = vmul.f32 %v25_v7, %v17_v8  ;;  %v49_v18 = vmul.f32 %v35_v6, %v19_v10 }
  0x7c   :  { %v30_v11 = vpop.permute.xlu0 %29  ;;  %v40_v15 = vpop.permute.xlu1 %39 }
  0x7d   :  { %v48_v13 = vmul.f32 %v30_v11, %v18_v9  ;;  %v50_v20 = vmul.f32 %v40_v15, %v20_v14 }
  0x7f   :  { %v52_v19 = vadd.f32 %v48_v13, %v47_v12 }
  0x81   :  { %v53_v21 = vadd.f32 %v52_v19, %v49_v18 }
  0x83   :  { %v54_v23 = vadd.f32 %v53_v21, %v50_v20 }
  0x85   :  { %v55_v24 = vadd.f32 %v54_v23, %v51_v22 }
  0x87   :  { %v56_v25 = vrot.slane %v55_v24, 4 }
  0x89   :  { %v57_v26 = vadd.f32 %v56_v25, %v55_v24 }
  0x8b   :  { %v58_v27 = vrot.slane %v57_v26, 2 }
  0x8d   :  { %v59_v28 = vadd.f32 %v58_v27, %v57_v26 }
  0x8f   :  { %v60_v29 = vrot.slane %v59_v28, 1 }
  0x91   :  { %v61_v30 = vadd.f32 %v60_v29, %v59_v28 }
  0x93   :  { %62 = vst [vmem:[#allocation2] sm:$0x1] %v61_v30 }
  0x94   :  { %73 = dma.vmem_to_hbm [thread:$0]  %s69_s29, 16, %s71_s4, [#allocation3]  }
  0x95   :  { %108 = dma.done.wait [#allocation3], 16  }
  0x96   :  { %109 = vsyncadd [#allocation3], 4294967280 }
  0x97   :  { %78 = vsyncpa [#allocation3], 1 }

</bundles_post_ra>
